<compile_context>
chip_gen: v7x
topology: tpu7x:2x2x1
jax: 0.10.0
libtpu: 0.0.40
codegen_flags: <defaults>
</compile_context>

<pallas_src>
import functools
from dataclasses import dataclass

import jax
import jax.numpy as jnp
from jax.experimental import pallas as pl
from jax.experimental.pallas import tpu as pltpu


# ----------------------------- Pallas kernel ------------------------------ #

def _colsum_score_kernel(x_ref, w_ref, o_ref, acc_ref, *, rows, kt):
    """Per-shard reward sum.

    Grid is (n_shards, tiles_per_shard); axis 0 is "parallel" (megacore on
    v7x, trivially size-1 elsewhere), axis 1 is the row reduction.

    x_ref  : VMEM (tm, H)  x.dtype  tile of flattened activations
    w_ref  : VMEM (1, H)   f32      lane-dense reward-head weight (resident)
    o_ref  : VMEM (1, 1)   f32      per-shard partial sum of x @ w
    acc_ref: VMEM (1, H)   f32      running per-column sums (persists)
    """
    s = pl.program_id(0)
    i = pl.program_id(1)
    tm = x_ref.shape[0]

    @pl.when(i == 0)
    def _():
        acc_ref[...] = jnp.zeros_like(acc_ref)

    row0 = (s * kt + i) * tm          # global row of this tile's first row
    full = row0 + tm <= rows          # tile entirely within valid rows?

    # Steady state: lane-dense column partial sums only (XLU sublane reduce +
    # VPU add; upcast to f32 in-register).  Kernel stays HBM-bound.
    @pl.when(full)
    def _():
        acc_ref[...] += jnp.sum(x_ref[...].astype(jnp.float32),
                                axis=0, keepdims=True)

    # Ragged (or fully out-of-range, clamped) tile: mask invalid rows to 0.
    # jnp.where (not multiply) so garbage/NaN in the OOB region cannot leak.
    @pl.when(jnp.logical_not(full))
    def _():
        row_ids = row0 + jax.lax.broadcasted_iota(jnp.int32, x_ref.shape, 0)
        xt = jnp.where(row_ids < rows, x_ref[...].astype(jnp.float32), 0.0)
        acc_ref[...] += jnp.sum(xt, axis=0, keepdims=True)

    @pl.when(i == kt - 1)
    def _():
        # Single dot with the lane-resident weight, once per shard.
        o_ref[...] = jnp.sum(acc_ref[...] * w_ref[...], keepdims=True)


# ------------------------- tile / budget selection ------------------------- #

def _vmem_limit_bytes():
    """Scoped-VMEM limit used both for CompilerParams and tile sizing:
    64 MiB on v5e/v6e (128 MiB physical), ~48 MiB on v7x (64 MiB physical)."""
    default_cap = 128 * 1024 * 1024
    try:
        info = pltpu.get_tpu_info()
        cap = int(getattr(info, "vmem_capacity_bytes", default_cap))
    except Exception:
        cap = default_cap
    return min(cap - 16 * 1024 * 1024, 64 * 1024 * 1024)


def _sublane(itemsize):
    # f32 -> 8 rows per vreg sublane group, bf16 -> 16, int8/fp8 -> 32.
    return max(8, 8 * (4 // max(1, itemsize)))


def _choose_tm(rows, hidden, itemsize, vmem_budget_bytes,
               target_tile_bytes=8 * 1024 * 1024):
    """Row tile sized by bytes: ~target_tile_bytes per x buffer, capped at a
    quarter of the scoped budget (x is double-buffered; leave headroom for
    w / acc / output / internal scratch), and never larger than the data."""
    sub = _sublane(itemsize)
    max_tile_bytes = min(target_tile_bytes, vmem_budget_bytes // 4)
    tm = max(sub, max_tile_bytes // max(1, hidden * itemsize))
    rows_rounded = ((rows + sub - 1) // sub) * sub
    tm = min(tm, rows_rounded)
    return max(sub, (tm // sub) * sub)


# --------------------------------- wrapper --------------------------------- #

def reward_score(x, w, b, *, tm=None, n_shards=1):
    """Mean reward over all rows of x, computed with a Pallas TPU kernel.

    x: [rows, hidden]  float32 or bfloat16 (read natively; upcast in-kernel)
    w: [hidden, 1]     float32
    b: scalar          float32
    n_shards: 1 on v5e/v6e (single TensorCore); 2 on v7x to use both cores.
    returns: scalar float32 = mean(x @ w + b)
    """
    rows, hidden = x.shape
    itemsize = jnp.dtype(x.dtype).itemsize
    vmem_limit = _vmem_limit_bytes()
    sub = _sublane(itemsize)
    if tm is None:
        tm = _choose_tm(rows, hidden, itemsize, vmem_limit)
    tm = max(sub, (tm // sub) * sub)

    w_row = w.reshape(1, hidden).astype(jnp.float32)

    total_tiles = pl.cdiv(rows, tm)
    kt = pl.cdiv(total_tiles, n_shards)   # tiles per shard

    def x_index_map(s, i):
        # Clamp so out-of-range shard tiles (only possible when n_shards > 1)
        # re-read the last tile; they are masked to zero inside the kernel.
        return (jnp.minimum(s * kt + i, total_tiles - 1), 0)

    partials = pl.pallas_call(
        functools.partial(_colsum_score_kernel, rows=rows, kt=kt),
        out_shape=jax.ShapeDtypeStruct((n_shards, 1), jnp.float32),
        grid_spec=pltpu.PrefetchScalarGridSpec(
            num_scalar_prefetch=0,
            grid=(n_shards, kt),
            in_specs=[
                # x tile: native dtype, ragged final block allowed (masked).
                pl.BlockSpec((tm, hidden), x_index_map),
                # w: lane-dense f32, resident across the whole grid.
                pl.BlockSpec((1, hidden), lambda s, i: (0, 0)),
            ],
            out_specs=pl.BlockSpec((1, 1), lambda s, i: (s, 0)),
            scratch_shapes=[pltpu.VMEM((1, hidden), jnp.float32)],
        ),
        compiler_params=pltpu.CompilerParams(
            dimension_semantics=("parallel", "arbitrary"),
            vmem_limit_bytes=vmem_limit,
        ),
    )(x, w_row)

    # mean(x @ w + b) == sum(x @ w) / rows + b   (bias folded out of kernel)
    return jnp.sum(partials) / jnp.float32(rows) + jnp.asarray(b, jnp.float32)


# --------------------------- EarlyStopper glue ----------------------------- #

@dataclass
class EarlyStopperReturn:
    should_stop: bool
    score: float


class EarlyStopper:
    """JAX/Pallas analogue of the PyTorch EarlyStopper.

    The "model" is a linear reward head (w, b); forward() scores a validation
    batch with the Pallas kernel, compares against past scores and records it.
    NOTE: for tiny validation sets the per-call host sync (float(...)) and
    dispatch dominate; keep the score on-device in a training loop if so.
    """

    def __init__(self, w, b, val_batch,
                 calculate_should_stop=lambda past_scores, score:
                     len(past_scores) > 0 and score < past_scores[-1]):
        self.w = w
        self.b = b
        self.val_batch = val_batch            # [batch, seq, hidden]
        self.scores = []
        self.calculate_should_stop = calculate_should_stop
        # TODO(synk): checkpoint save/load of model weights (torch.save /
        # load_state_dict in the original) has no Pallas equivalent; omitted.

    def forward(self) -> EarlyStopperReturn:
        bsz, seq, hidden = self.val_batch.shape
        x_flat = self.val_batch.reshape(bsz * seq, hidden)
        score = float(jax.block_until_ready(
            reward_score(x_flat, self.w, self.b)))
        should_stop = self.calculate_should_stop(self.scores, score)
        self.scores.append(score)
        return EarlyStopperReturn(should_stop=should_stop, score=score)

    __call__ = forward


# --------------------------------- main ------------------------------------ #

if __name__ == "__main__":
    key = jax.random.PRNGKey(0)
    kx, kw = jax.random.split(key)

    batch, seq, hidden = 2, 8, 128
    x = jax.random.normal(kx, (batch, seq, hidden), dtype=jnp.float32)
    w = jax.random.normal(kw, (hidden, 1), dtype=jnp.float32) * 0.02
    b = jnp.float32(0.1)

    # reference check (plain JAX)
    ref = jnp.mean(x.reshape(-1, hidden) @ w + b)

    stopper = EarlyStopper(w, b, x)
    out1 = stopper()                       # first eval -> never stops
    out2 = stopper()                       # same score -> should_stop False

    got = jnp.float32(out1.score)
    assert jnp.allclose(got, ref, atol=1e-5, rtol=1e-5), (got, ref)
    assert out1.should_stop is False
    assert out2.should_stop is False       # score not strictly lower

    # non-divisible-rows path: ragged final block, masked in-kernel (no pad)
    odd_rows = 13
    x_odd = jax.random.normal(key, (odd_rows, hidden), dtype=jnp.float32)
    got_odd = reward_score(x_odd, w, b)
    ref_odd = jnp.mean(x_odd @ w + b)
    assert jnp.allclose(got_odd, ref_odd, atol=1e-5, rtol=1e-5), (got_odd, ref_odd)

    # native-bf16 path: kernel reads bf16 tiles directly, upcasts in-register
    x_bf16 = x.reshape(-1, hidden).astype(jnp.bfloat16)
    got_bf16 = reward_score(x_bf16, w, b)
    ref_bf16 = jnp.mean(x_bf16.astype(jnp.float32) @ w + b)
    assert jnp.allclose(got_bf16, ref_bf16, atol=1e-2, rtol=1e-2), (got_bf16, ref_bf16)

    jax.block_until_ready(got_bf16)
    print("KERNEL_OK")
</pallas_src>

<mosaic_0001>
module attributes {stable_mosaic.version = 11 : i64} {
  func.func @_colsum_score_kernel(%arg0: i32, %arg1: i32, %arg2: memref<16x128xf32, #tpu.memory_space<vmem>>, %arg3: memref<1x128xf32, #tpu.memory_space<vmem>>, %arg4: memref<1x1xf32, #tpu.memory_space<vmem>>, %arg5: memref<1x128xf32, #tpu.memory_space<vmem>>) attributes {dimension_semantics = [#tpu.dimension_semantics<parallel>, #tpu.dimension_semantics<arbitrary>], iteration_bounds = array<i64: 1, 1>, scalar_prefetch = 0 : i64, scratch_operands = 1 : i64, tpu.core_type = #tpu.core_type<tc>, window_params = [{transform_indices = @transform_0, window_bounds = array<i64: 16, 128>}, {pipeline_mode = #tpu.pipeline_mode<synchronous>, transform_indices = @transform_1, window_bounds = array<i64: 1, 128>}, {transform_indices = @transform_2, window_bounds = array<i64: 1, 1>}]} {
    %c0_i32 = arith.constant 0 : i32
    %0 = arith.cmpi eq, %arg1, %c0_i32 : i32
    %1 = arith.extui %0 : i1 to i32
    %c0_i32_0 = arith.constant 0 : i32
    %2 = arith.cmpi ne, %1, %c0_i32_0 : i32
    scf.if %2 {
      %cst = arith.constant 0.000000e+00 : f32
      %16 = vector.broadcast %cst : f32 to vector<1x128xf32>
      %c0 = arith.constant 0 : index
      %c0_7 = arith.constant 0 : index
      %17 = vector.load %arg5[%c0, %c0_7] : memref<1x128xf32, #tpu.memory_space<vmem>>, vector<1x128xf32>
      tpu.vector_store %arg5[%c0, %c0_7], %16 {strides = array<i32>} : memref<1x128xf32, #tpu.memory_space<vmem>>, vector<1x128xf32>,
    } else {
    }
    %c1_i32 = arith.constant 1 : i32
    %3 = arith.muli %arg0, %c1_i32 : i32
    %4 = arith.addi %3, %arg1 : i32
    %c16_i32 = arith.constant 16 : i32
    %5 = arith.muli %4, %c16_i32 : i32
    %c16_i32_1 = arith.constant 16 : i32
    %6 = arith.addi %5, %c16_i32_1 : i32
    %c16_i32_2 = arith.constant 16 : i32
    %7 = arith.cmpi sle, %6, %c16_i32_2 : i32
    %8 = arith.extui %7 : i1 to i32
    %c0_i32_3 = arith.constant 0 : i32
    %9 = arith.cmpi ne, %8, %c0_i32_3 : i32
    scf.if %9 {
      %c0 = arith.constant 0 : index
      %c0_7 = arith.constant 0 : index
      %16 = vector.load %arg5[%c0, %c0_7] : memref<1x128xf32, #tpu.memory_space<vmem>>, vector<1x128xf32>
      %c0_8 = arith.constant 0 : index
      %c0_9 = arith.constant 0 : index
      %17 = vector.load %arg2[%c0_8, %c0_9] : memref<16x128xf32, #tpu.memory_space<vmem>>, vector<16x128xf32>
      %cst = arith.constant dense<0.000000e+00> : vector<128xf32>
      %18 = vector.multi_reduction <add>, %17, %cst [0] : vector<16x128xf32> to vector<128xf32>
      %19 = vector.shape_cast %18 : vector<128xf32> to vector<1x128xf32>
      %20 = arith.addf %16, %19 : vector<1x128xf32>
      %c0_10 = arith.constant 0 : index
      %c0_11 = arith.constant 0 : index
      %21 = vector.load %arg5[%c0_10, %c0_11] : memref<1x128xf32, #tpu.memory_space<vmem>>, vector<1x128xf32>
      tpu.vector_store %arg5[%c0_10, %c0_11], %20 {strides = array<i32>} : memref<1x128xf32, #tpu.memory_space<vmem>>, vector<1x128xf32>,
    } else {
    }
    %true = arith.constant true
    %10 = arith.xori %7, %true : i1
    %11 = arith.extui %10 : i1 to i32
    %c0_i32_4 = arith.constant 0 : i32
    %12 = arith.cmpi ne, %11, %c0_i32_4 : i32
    scf.if %12 {
      %16 = tpu.iota {dimensions = array<i32: 0>} : vector<16x128xi32>
      %17 = vector.broadcast %5 : i32 to vector<16x128xi32>
      %18 = arith.addi %17, %16 : vector<16x128xi32>
      %c16_i32_7 = arith.constant 16 : i32
      %19 = vector.broadcast %c16_i32_7 : i32 to vector<16x128xi32>
      %20 = arith.cmpi slt, %18, %19 : vector<16x128xi32>
      %c0 = arith.constant 0 : index
      %c0_8 = arith.constant 0 : index
      %21 = vector.load %arg2[%c0, %c0_8] : memref<16x128xf32, #tpu.memory_space<vmem>>, vector<16x128xf32>
      %cst = arith.constant 0.000000e+00 : f32
      %22 = vector.broadcast %cst : f32 to vector<16x128xf32>
      %23 = arith.select %20, %21, %22 : vector<16x128xi1>, vector<16x128xf32>
      %c0_9 = arith.constant 0 : index
      %c0_10 = arith.constant 0 : index
      %24 = vector.load %arg5[%c0_9, %c0_10] : memref<1x128xf32, #tpu.memory_space<vmem>>, vector<1x128xf32>
      %cst_11 = arith.constant dense<0.000000e+00> : vector<128xf32>
      %25 = vector.multi_reduction <add>, %23, %cst_11 [0] : vector<16x128xf32> to vector<128xf32>
      %26 = vector.shape_cast %25 : vector<128xf32> to vector<1x128xf32>
      %27 = arith.addf %24, %26 : vector<1x128xf32>
      %c0_12 = arith.constant 0 : index
      %c0_13 = arith.constant 0 : index
      %28 = vector.load %arg5[%c0_12, %c0_13] : memref<1x128xf32, #tpu.memory_space<vmem>>, vector<1x128xf32>
      tpu.vector_store %arg5[%c0_12, %c0_13], %27 {strides = array<i32>} : memref<1x128xf32, #tpu.memory_space<vmem>>, vector<1x128xf32>,
    } else {
    }
    %c0_i32_5 = arith.constant 0 : i32
    %13 = arith.cmpi eq, %arg1, %c0_i32_5 : i32
    %14 = arith.extui %13 : i1 to i32
    %c0_i32_6 = arith.constant 0 : i32
    %15 = arith.cmpi ne, %14, %c0_i32_6 : i32
    scf.if %15 {
      %c0 = arith.constant 0 : index
      %c0_7 = arith.constant 0 : index
      %16 = vector.load %arg5[%c0, %c0_7] : memref<1x128xf32, #tpu.memory_space<vmem>>, vector<1x128xf32>
      %c0_8 = arith.constant 0 : index
      %c0_9 = arith.constant 0 : index
      %17 = vector.load %arg3[%c0_8, %c0_9] : memref<1x128xf32, #tpu.memory_space<vmem>>, vector<1x128xf32>
      %18 = arith.mulf %16, %17 : vector<1x128xf32>
      %19 = vector.shape_cast %18 : vector<1x128xf32> to vector<1x1x128xf32>
      %cst = arith.constant dense<0.000000e+00> : vector<1xf32>
      %20 = vector.multi_reduction <add>, %19, %cst [1, 2] : vector<1x1x128xf32> to vector<1xf32>
      %21 = vector.shape_cast %20 : vector<1xf32> to vector<1x1x1xf32>
      %22 = vector.extract %21[0, 0, 0] : f32 from vector<1x1x1xf32>
      %23 = vector.broadcast %22 : f32 to vector<1x1xf32>
      %c0_10 = arith.constant 0 : index
      %c0_11 = arith.constant 0 : index
      %24 = vector.load %arg4[%c0_10, %c0_11] : memref<1x1xf32, #tpu.memory_space<vmem>>, vector<1x1xf32>
      tpu.vector_store %arg4[%c0_10, %c0_11], %23 {strides = array<i32>} : memref<1x1xf32, #tpu.memory_space<vmem>>, vector<1x1xf32>,
    } else {
    }
    return
  }
  func.func @transform_0(%arg0: i32, %arg1: i32) -> (i32, i32) {
    %c1_i32 = arith.constant 1 : i32
    %0 = arith.muli %arg0, %c1_i32 : i32
    %1 = arith.addi %0, %arg1 : i32
    %c0_i32 = arith.constant 0 : i32
    %2 = arith.minsi %1, %c0_i32 : i32
    %c0_i32_0 = arith.constant 0 : i32
    %c0_i32_1 = arith.constant 0 : i32
    return %2, %c0_i32_0 : i32, i32
  }
  func.func @transform_1(%arg0: i32, %arg1: i32) -> (i32, i32) {
    %c0_i32 = arith.constant 0 : i32
    %c0_i32_0 = arith.constant 0 : i32
    %c0_i32_1 = arith.constant 0 : i32
    return %c0_i32, %c0_i32_0 : i32, i32
  }
  func.func @transform_2(%arg0: i32, %arg1: i32) -> (i32, i32) {
    %c0_i32 = arith.constant 0 : i32
    %c0_i32_0 = arith.constant 0 : i32
    return %arg0, %c0_i32 : i32, i32
  }
}

</mosaic_0001>

<bundles_post_ra>
// kernel: tpu_custom_call.1
= control target key start
LH: loop header
LB: loop body
LE: loop exit
PB: predicated region body
PF: predicated region fallthrough
CT: control target
= control target key end

     0   :  { %7 = vsyncpa [#allocation4], 0  ;;  %s273_s0 = inlined_call_operand.hbm [shape: f32[16,128], index: 0, kind: input, shape index: {}]   ;;  %s274_s1 = inlined_call_operand.hbm [shape: f32[1,128], index: 1, kind: input, shape index: {}]   ;;  %s275_s2 = inlined_call_operand.hbm [shape: f32[1,1], index: 2, kind: output, shape index: {}]  }
   0x1   :  { %8 = vsyncpa [#allocation7], 0 }
   0x2   :  { %9 = vsyncpa [#allocation5], 0  ;;  %s216_s9 = smov [#allocation3]   ;;  %s144_s13 = scalar_lea.hbm %s273_s0, 256 }
   0x3   :  { %s21_s10 = sshll.u32 %s216_s9, 4  ;;  %p145_p0 = scmp.ne.s32.totalorder %s273_s0, %s144_s13  ;;  %s22_s10 = int_to_ptr.vmem [resolvable:$true] %s21_s10 }
   0x4   :  { %p148_p1 = scmp.lt.u32.totalorder %s144_s13, %s273_s0 }
   0x6   :  { %p150_p2 = pnand %p148_p1, %p145_p0 }
   0x8   :  { %153 = shalt.err (!%p150_p2)
}
   0x9   :  { %s154_s18 = scalar_lea.vmem %s22_s10, 256  ;;  %p159_p4 = scmp.lt.s32.totalorder %s22_s10, %s22_s10 }
   0xa   :  { %p155_p3 = scmp.ne.s32.totalorder %s22_s10, %s154_s18  ;;  %p160_p5 = scmp.lt.s32.totalorder %s154_s18, %s154_s18 }
   0xc   :  { %p161_p6 = por %p160_p5, %p159_p4 }
   0xe   :  { %p162_p7 = pnand %p161_p6, %p155_p3 }
  0x10   :  { %165 = shalt.err (!%p162_p7)
}
  0x11   :  { %s217_s19 = smov 128   ;;  %s218_s20 = smov 8  }
  0x12   :  { %27 = dma.hbm_to_vmem [thread:$0]  %s273_s0, 256, %s22_s10, [#allocation4], %s217_s19, %s217_s19, %s218_s20  }
  0x13   :  { %s219_s23 = smov [#allocation6]   ;;  %s166_s27 = scalar_lea.hbm %s274_s1, 16 }
  0x14   :  { %s34_s24 = sshll.u32 %s219_s23, 4  ;;  %p167_p8 = scmp.ne.s32.totalorder %s274_s1, %s166_s27  ;;  %s35_s24 = int_to_ptr.vmem [resolvable:$true] %s34_s24 }
  0x15   :  { %p170_p9 = scmp.lt.u32.totalorder %s166_s27, %s274_s1 }
  0x17   :  { %p172_p10 = pnand %p170_p9, %p167_p8 }
  0x19   :  { %175 = shalt.err (!%p172_p10)
}
  0x1a   :  { %s176_s4 = scalar_lea.vmem %s35_s24, 16  ;;  %s180_s0 = scalar_lea.vmem %s35_s24, 32 }
  0x1b   :  { %p177_p11 = scmp.ne.s32.totalorder %s35_s24, %s176_s4  ;;  %p181_p12 = scmp.lt.s32.totalorder %s35_s24, %s35_s24 }
  0x1c   :  { %p182_p13 = scmp.lt.s32.totalorder %s180_s0, %s176_s4 }
  0x1e   :  { %p183_p0 = por %p182_p13, %p181_p12 }
  0x20   :  { %p184_p1 = pnand %p183_p0, %p177_p11 }
  0x22   :  { %187 = shalt.err (!%p184_p1)
}
  0x23   :  { %37 = dma.hbm_to_vmem [thread:$0]  %s274_s1, 16, %s35_s24, [#allocation7]  }
  0x24   :  { %210 = dma.done.wait [#allocation4], 256  }
  0x25   :  { %211 = vsyncadd [#allocation4], 4294967040 }
  0x26   :  { %212 = dma.done.wait [#allocation7], 16  }
  0x27   :  { %213 = vsyncadd [#allocation7], 4294967280  ;;  %v220_v0 = vmov 0.0   ;;  %v61_v1 = vld [vmem:[#allocation3] sm:$0xff]  ;;  %v62_v2 = vld [vmem:[#allocation3 + $0x8] sm:$0xff]  ;;  %vm104_vm0 = vcmask 1040384  }
  0x28   :  { %52 = vst [vmem:[#allocation2] sm:$0x1] %v220_v0  ;;  %v63_v3 = vadd.f32 %v62_v2, %v61_v1  ;;  %v102_v12 = vld [vmem:[#allocation6] sm:$0x1]  ;;  %s221_s1 = smov [#allocation8]   ;;  %vm116_vm1 = vcmask 0  }
  0x29   :  { %s124_s7 = sshll.u32 %s221_s1, 4  ;;  %s125_s7 = int_to_ptr.vmem [resolvable:$true] %s124_s7 }
  0x2a   :  { %v64_v4 = vrot.slane %v63_v3, 4  ;;  %s188_s9 = scalar_lea.vmem %s125_s7, 16  ;;  %s192_s10 = scalar_lea.vmem %s125_s7, 32 }
  0x2b   :  { %p189_p2 = scmp.ne.s32.totalorder %s125_s7, %s188_s9  ;;  %p193_p3 = scmp.lt.s32.totalorder %s125_s7, %s125_s7 }
  0x2c   :  { %v65_v5 = vadd.f32 %v64_v4, %v63_v3  ;;  %p194_p4 = scmp.lt.s32.totalorder %s192_s10, %s188_s9 }
  0x2e   :  { %v66_v6 = vrot.slane %v65_v5, 2  ;;  %p195_p5 = por %p194_p4, %p193_p3 }
  0x2f   :  { %v60_v9 = vld [vmem:[#allocation2] sm:$0x1] }
  0x30   :  { %v67_v7 = vadd.f32 %v66_v6, %v65_v5  ;;  %p196_p6 = pnand %p195_p5, %p189_p2 }
  0x32   :  { %v68_v8 = vrot.slane %v67_v7, 1 }
  0x34   :  { %v69_v10 = vadd.f32 %v68_v8, %v67_v7 }
  0x36   :  { %v70_v11 = vadd.f32 %v69_v10, %v60_v9 }
  0x38   :  { %71 = vst [vmem:[#allocation2] sm:$0x1] %v70_v11 }
  0x3f   :  { %v101_v13 = vld [vmem:[#allocation2] sm:$0x1] }
  0x40   :  { %v103_v14 = vmul.f32 %v102_v12, %v101_v13 }
  0x42   :  { %v105_v15 = vsel %vm104_vm0, %v103_v14, 0.0 }
  0x43   :  { %106 = vadd.xlane.f32.xlu0 %v105_v15 }
  0xd0   :  { %v107_v16 = vpop.xlane.xlu0 %106 }
  0xd1   :  { %v108_v17 = vrot.slane %v107_v16, 4 }
  0xd3   :  { %v109_v18 = vadd.f32 %v108_v17, %v107_v16 }
  0xd5   :  { %v110_v19 = vrot.slane %v109_v18, 2 }
  0xd7   :  { %v111_v20 = vadd.f32 %v110_v19, %v109_v18 }
  0xd9   :  { %v112_v21 = vrot.slane %v111_v20, 1 }
  0xdb   :  { %v113_v22 = vadd.f32 %v112_v21, %v111_v20 }
  0xdd   :  { %136 = vpush %v113_v22 }
 0x10e   :  { %s137_s8 = spop %136 }
 0x10f   :  { %v115_v23 = vstv %s137_s8 }
 0x110   :  { %117 = vst.msk [vmem:[#allocation8] sm:$0x1] %vm116_vm1, %v115_v23 }
 0x111   :  { %199 = shalt.err (!%p196_p6)
}
 0x112   :  { %s200_s13 = scalar_lea.hbm %s275_s2, 16 }
 0x113   :  { %p201_p7 = scmp.ne.s32.totalorder %s275_s2, %s200_s13  ;;  %p204_p8 = scmp.lt.u32.totalorder %s200_s13, %s275_s2 }
 0x115   :  { %p206_p9 = pnand %p204_p8, %p201_p7 }
 0x117   :  { %209 = shalt.err (!%p206_p9)
}
 0x118   :  { %127 = dma.vmem_to_hbm [thread:$0]  %s125_s7, 16, %s275_s2, [#allocation5]  }
 0x119   :  { %214 = dma.done.wait [#allocation5], 16  }
 0x11a   :  { %215 = vsyncadd [#allocation5], 4294967280 }
 0x11b   :  { %131 = vsyncpa [#allocation4], 1 }
 0x11c   :  { %132 = vsyncpa [#allocation7], 1 }
 0x11d   :  { %133 = vsyncpa [#allocation5], 1 }

</bundles_post_ra>
